<compile_context>
chip_gen: v7x
topology: tpu7x:2x2x1
jax: 0.10.0
libtpu: 0.0.40
codegen_flags: <defaults>
</compile_context>

<pallas_src>
import jax
import jax.numpy as jnp
from jax import lax
from jax.experimental import pallas as pl
from jax.experimental.pallas import tpu as pltpu

VOCAB = 512          # synthetic vocab (multiple of 128 -> lane-dense logits)
HIDDEN = 128         # synthetic hidden size (one vreg lane width)
EOS = 198            # matches FinishMySentence default eos
DEFAULT_TOKEN = 0    # matches self.default_token
MAX_NEW_TOKENS = 8   # safety cap for the greedy loop


def greedy_decode_kernel(acc0_ref, ew_ref, gen_ref):
    # acc0_ref : VMEM (1, 1, VOCAB)          f32   -- prompt logits sum (this sentence)
    # ew_ref   : VMEM (VOCAB, VOCAB)         f32   -- token -> logits table (resident)
    # gen_ref  : VMEM (1, 1, MAX_NEW_TOKENS) i32   -- generated tokens (-1 = unused slot)
    lane = lax.broadcasted_iota(jnp.int32, (1, VOCAB), 1)            # hoisted
    slot = lax.broadcasted_iota(jnp.int32, (1, MAX_NEW_TOKENS), 1)   # hoisted

    acc_init = acc0_ref[0]                                   # (1, VOCAB) running logits sum
    gen_init = jnp.full((1, MAX_NEW_TOKENS), -1, jnp.int32)  # -1 sentinel = "no token"
    done_init = jnp.asarray(DEFAULT_TOKEN == EOS)            # original loop-entry condition

    def step(i, carry):
        acc, gen, done = carry
        # argmax over vocab, first occurrence on ties (matches torch.argmax).
        # (scale-invariant: the running sum is used directly, no mean division.)
        max_val = jnp.max(acc, axis=-1, keepdims=True)               # XLU lane reduce
        cand = jnp.where(acc >= max_val, lane, VOCAB)
        new_tok = jnp.min(cand)                                      # XLU lane reduce

        active = jnp.logical_not(done)
        # Predicated append: lane-select into the in-register generated-token vector.
        gen = jnp.where(jnp.logical_and(slot == i, active), new_tok, gen)
        # Fold the new token's logits row into the running sum (only while active).
        row = ew_ref[pl.ds(new_tok, 1), :]                           # (1, VOCAB) row gather
        acc = jnp.where(active, acc + row, acc)
        done = jnp.logical_or(done, new_tok == EOS)
        return acc, gen, done

    _, gen, _ = lax.fori_loop(0, MAX_NEW_TOKENS, step,
                              (acc_init, gen_init, done_init), unroll=True)
    gen_ref[0] = gen


@jax.jit
def _decode_call(acc0, ew):
    b = acc0.shape[0]
    return pl.pallas_call(
        greedy_decode_kernel,
        out_shape=jax.ShapeDtypeStruct((b, 1, MAX_NEW_TOKENS), jnp.int32),
        grid=(b,),
        in_specs=[
            pl.BlockSpec((1, 1, VOCAB), lambda i: (i, 0, 0)),            # per-sentence acc0
            pl.BlockSpec(memory_space=pltpu.MemorySpace.VMEM),           # EW, whole + resident
        ],
        out_specs=pl.BlockSpec((1, 1, MAX_NEW_TOKENS), lambda i: (i, 0, 0)),
        compiler_params=pltpu.CompilerParams(
            dimension_semantics=("parallel",)),                          # v7x: 2 TCs
    )(acc0, ew)


def finish_my_sentences(prompts, emb, w_out):
    """Greedy decode a batch of prompts with ONE fused kernel launch."""
    assert EOS != DEFAULT_TOKEN, "EOS equal to the default token would generate nothing"
    # Precompute the token -> logits table once (off the serial decode path).
    ew = jnp.dot(emb, w_out, preferred_element_type=jnp.float32)        # (VOCAB, VOCAB)
    accs = []
    clipped = []
    for p in prompts:
        p = jnp.clip(jnp.asarray(p, jnp.int32), 0, VOCAB - 1)
        clipped.append(p)
        accs.append(jnp.sum(ew[p], axis=0, keepdims=True))              # prompt logits sum
    acc0 = jnp.stack(accs, axis=0)                                       # (B, 1, VOCAB)

    gen = _decode_call(acc0, ew)                                         # (B, 1, MAX_NEW)
    gen = jax.device_get(gen)[:, 0, :]

    sentences = []
    for p, g in zip(clipped, gen):
        n = int((g >= 0).sum())                                          # contiguous prefix
        sentences.append(jnp.concatenate([p, jnp.asarray(g[:n], jnp.int32)]))
    return sentences


def finish_my_sentence(x, emb, w_out):
    """Single-prompt equivalent of the module's forward(x)."""
    return finish_my_sentences([x], emb, w_out)[0]


def _reference_decode(x, emb, w_out):
    """Pure-JAX reference with identical semantics (host-driven greedy loop)."""
    ew = jnp.dot(emb, w_out, preferred_element_type=jnp.float32)
    x = jnp.clip(jnp.asarray(x, jnp.int32), 0, VOCAB - 1)
    acc = jnp.sum(ew[x], axis=0, keepdims=True)
    sentence = [int(t) for t in x]
    token = DEFAULT_TOKEN
    steps = 0
    while token != EOS and steps < MAX_NEW_TOKENS:
        token = int(jnp.argmax(acc[0]))          # argmax of prefix logits (scale-invariant)
        sentence.append(token)
        acc = acc + ew[token][None, :]
        steps += 1
    return jnp.asarray(sentence, jnp.int32)


if __name__ == "__main__":
    key = jax.random.PRNGKey(0)
    k_emb, k_head, k_tok = jax.random.split(key, 3)

    # Deterministic synthetic "GPT-2" parameters (embedding table + LM head).
    emb = (0.02 * jax.random.normal(k_emb, (VOCAB, HIDDEN))).astype(jnp.float32)
    w_out = (0.02 * jax.random.normal(k_head, (HIDDEN, VOCAB))).astype(jnp.float32)

    # Two prompts of 5 tokens each (mirrors `torch.randint(10000, (5,))`, clipped to vocab).
    toks = jax.random.randint(k_tok, (2, 5), 0, VOCAB, dtype=jnp.int32)
    prompts = [toks[0], toks[1]]

    sentences = finish_my_sentences(prompts, emb, w_out)
    jax.block_until_ready(sentences)

    for x, s in zip(prompts, sentences):
        ref = _reference_decode(x, emb, w_out)
        assert s.dtype == jnp.int32
        assert s.shape[0] > x.shape[0]
        assert jnp.array_equal(s[: x.shape[0]], x)
        assert jnp.array_equal(s, ref), (s, ref)

    print("KERNEL_OK")
</pallas_src>

<mosaic_0001>
module attributes {stable_mosaic.version = 11 : i64} {
  func.func @greedy_decode_kernel(%arg0: i32, %arg1: memref<1x1x512xf32, #tpu.memory_space<vmem>>, %arg2: memref<512x512xf32, #tpu.memory_space<vmem>>, %arg3: memref<1x1x8xi32, #tpu.memory_space<vmem>>) attributes {dimension_semantics = [#tpu.dimension_semantics<parallel>], iteration_bounds = array<i64: 2>, scalar_prefetch = 0 : i64, scratch_operands = 0 : i64, tpu.core_type = #tpu.core_type<tc>, window_params = [{transform_indices = @transform_0, window_bounds = array<i64: 1, 1, 512>}, {pipeline_mode = #tpu.pipeline_mode<synchronous>, transform_indices = @transform_1, window_bounds = array<i64: 512, 512>}, {transform_indices = @transform_2, window_bounds = array<i64: 1, 1, 8>}]} {
    %0 = tpu.iota {dimensions = array<i32: 1>} : vector<1x512xi32>
    %1 = tpu.iota {dimensions = array<i32: 1>} : vector<1x8xi32>
    %c0 = arith.constant 0 : index
    %c0_0 = arith.constant 0 : index
    %c0_1 = arith.constant 0 : index
    %2 = vector.load %arg1[%c0, %c0_0, %c0_1] : memref<1x1x512xf32, #tpu.memory_space<vmem>>, vector<1x1x512xf32>
    %3 = vector.shape_cast %2 : vector<1x1x512xf32> to vector<1x512xf32>
    %c-1_i32 = arith.constant -1 : i32
    %4 = vector.broadcast %c-1_i32 : i32 to vector<1x8xi32>
    %false = arith.constant false
    %c0_i32 = arith.constant 0 : i32
    %cst = arith.constant dense<0xFF800000> : vector<1xf32>
    %5 = vector.multi_reduction <maximumf>, %3, %cst [1] : vector<1x512xf32> to vector<1xf32>
    %6 = vector.shape_cast %5 : vector<1xf32> to vector<1x1xf32>
    %7 = vector.broadcast %6 : vector<1x1xf32> to vector<1x512xf32>
    %8 = arith.cmpf oge, %3, %7 : vector<1x512xf32>
    %c512_i32 = arith.constant 512 : i32
    %9 = vector.broadcast %c512_i32 : i32 to vector<1x512xi32>
    %10 = arith.select %8, %0, %9 : vector<1x512xi1>, vector<1x512xi32>
    %11 = vector.shape_cast %10 : vector<1x512xi32> to vector<1x1x512xi32>
    %cst_2 = arith.constant dense<2147483647> : vector<1xi32>
    %12 = vector.multi_reduction <minsi>, %11, %cst_2 [1, 2] : vector<1x1x512xi32> to vector<1xi32>
    %13 = vector.shape_cast %12 : vector<1xi32> to vector<1x1x1xi32>
    %14 = vector.extract %13[0, 0, 0] : i32 from vector<1x1x1xi32>
    %true = arith.constant true
    %15 = arith.xori %false, %true : i1
    %16 = vector.broadcast %c0_i32 : i32 to vector<1x8xi32>
    %17 = arith.cmpi eq, %1, %16 : vector<1x8xi32>
    %18 = vector.broadcast %15 : i1 to vector<1x8xi1>
    %19 = arith.andi %17, %18 : vector<1x8xi1>
    %20 = vector.broadcast %14 : i32 to vector<1x8xi32>
    %21 = arith.select %19, %20, %4 : vector<1x8xi1>, vector<1x8xi32>
    %22 = arith.index_cast %14 : i32 to index
    %c0_3 = arith.constant 0 : index
    %23 = vector.load %arg2[%22, %c0_3] : memref<512x512xf32, #tpu.memory_space<vmem>>, vector<1x512xf32>
    %24 = arith.addf %3, %23 : vector<1x512xf32>
    %25 = arith.select %15, %24, %3 : vector<1x512xf32>
    %c198_i32 = arith.constant 198 : i32
    %26 = arith.cmpi eq, %14, %c198_i32 : i32
    %27 = arith.ori %false, %26 : i1
    %c1_i32 = arith.constant 1 : i32
    %cst_4 = arith.constant dense<0xFF800000> : vector<1xf32>
    %28 = vector.multi_reduction <maximumf>, %25, %cst_4 [1] : vector<1x512xf32> to vector<1xf32>
    %29 = vector.shape_cast %28 : vector<1xf32> to vector<1x1xf32>
    %30 = vector.broadcast %29 : vector<1x1xf32> to vector<1x512xf32>
    %31 = arith.cmpf oge, %25, %30 : vector<1x512xf32>
    %c512_i32_5 = arith.constant 512 : i32
    %32 = vector.broadcast %c512_i32_5 : i32 to vector<1x512xi32>
    %33 = arith.select %31, %0, %32 : vector<1x512xi1>, vector<1x512xi32>
    %34 = vector.shape_cast %33 : vector<1x512xi32> to vector<1x1x512xi32>
    %cst_6 = arith.constant dense<2147483647> : vector<1xi32>
    %35 = vector.multi_reduction <minsi>, %34, %cst_6 [1, 2] : vector<1x1x512xi32> to vector<1xi32>
    %36 = vector.shape_cast %35 : vector<1xi32> to vector<1x1x1xi32>
    %37 = vector.extract %36[0, 0, 0] : i32 from vector<1x1x1xi32>
    %true_7 = arith.constant true
    %38 = arith.xori %27, %true_7 : i1
    %39 = vector.broadcast %c1_i32 : i32 to vector<1x8xi32>
    %40 = arith.cmpi eq, %1, %39 : vector<1x8xi32>
    %41 = vector.broadcast %38 : i1 to vector<1x8xi1>
    %42 = arith.andi %40, %41 : vector<1x8xi1>
    %43 = vector.broadcast %37 : i32 to vector<1x8xi32>
    %44 = arith.select %42, %43, %21 : vector<1x8xi1>, vector<1x8xi32>
    %45 = arith.index_cast %37 : i32 to index
    %c0_8 = arith.constant 0 : index
    %46 = vector.load %arg2[%45, %c0_8] : memref<512x512xf32, #tpu.memory_space<vmem>>, vector<1x512xf32>
    %47 = arith.addf %25, %46 : vector<1x512xf32>
    %48 = arith.select %38, %47, %25 : vector<1x512xf32>
    %c198_i32_9 = arith.constant 198 : i32
    %49 = arith.cmpi eq, %37, %c198_i32_9 : i32
    %50 = arith.ori %27, %49 : i1
    %c2_i32 = arith.constant 2 : i32
    %cst_10 = arith.constant dense<0xFF800000> : vector<1xf32>
    %51 = vector.multi_reduction <maximumf>, %48, %cst_10 [1] : vector<1x512xf32> to vector<1xf32>
    %52 = vector.shape_cast %51 : vector<1xf32> to vector<1x1xf32>
    %53 = vector.broadcast %52 : vector<1x1xf32> to vector<1x512xf32>
    %54 = arith.cmpf oge, %48, %53 : vector<1x512xf32>
    %c512_i32_11 = arith.constant 512 : i32
    %55 = vector.broadcast %c512_i32_11 : i32 to vector<1x512xi32>
    %56 = arith.select %54, %0, %55 : vector<1x512xi1>, vector<1x512xi32>
    %57 = vector.shape_cast %56 : vector<1x512xi32> to vector<1x1x512xi32>
    %cst_12 = arith.constant dense<2147483647> : vector<1xi32>
    %58 = vector.multi_reduction <minsi>, %57, %cst_12 [1, 2] : vector<1x1x512xi32> to vector<1xi32>
    %59 = vector.shape_cast %58 : vector<1xi32> to vector<1x1x1xi32>
    %60 = vector.extract %59[0, 0, 0] : i32 from vector<1x1x1xi32>
    %true_13 = arith.constant true
    %61 = arith.xori %50, %true_13 : i1
    %62 = vector.broadcast %c2_i32 : i32 to vector<1x8xi32>
    %63 = arith.cmpi eq, %1, %62 : vector<1x8xi32>
    %64 = vector.broadcast %61 : i1 to vector<1x8xi1>
    %65 = arith.andi %63, %64 : vector<1x8xi1>
    %66 = vector.broadcast %60 : i32 to vector<1x8xi32>
    %67 = arith.select %65, %66, %44 : vector<1x8xi1>, vector<1x8xi32>
    %68 = arith.index_cast %60 : i32 to index
    %c0_14 = arith.constant 0 : index
    %69 = vector.load %arg2[%68, %c0_14] : memref<512x512xf32, #tpu.memory_space<vmem>>, vector<1x512xf32>
    %70 = arith.addf %48, %69 : vector<1x512xf32>
    %71 = arith.select %61, %70, %48 : vector<1x512xf32>
    %c198_i32_15 = arith.constant 198 : i32
    %72 = arith.cmpi eq, %60, %c198_i32_15 : i32
    %73 = arith.ori %50, %72 : i1
    %c3_i32 = arith.constant 3 : i32
    %cst_16 = arith.constant dense<0xFF800000> : vector<1xf32>
    %74 = vector.multi_reduction <maximumf>, %71, %cst_16 [1] : vector<1x512xf32> to vector<1xf32>
    %75 = vector.shape_cast %74 : vector<1xf32> to vector<1x1xf32>
    %76 = vector.broadcast %75 : vector<1x1xf32> to vector<1x512xf32>
    %77 = arith.cmpf oge, %71, %76 : vector<1x512xf32>
    %c512_i32_17 = arith.constant 512 : i32
    %78 = vector.broadcast %c512_i32_17 : i32 to vector<1x512xi32>
    %79 = arith.select %77, %0, %78 : vector<1x512xi1>, vector<1x512xi32>
    %80 = vector.shape_cast %79 : vector<1x512xi32> to vector<1x1x512xi32>
    %cst_18 = arith.constant dense<2147483647> : vector<1xi32>
    %81 = vector.multi_reduction <minsi>, %80, %cst_18 [1, 2] : vector<1x1x512xi32> to vector<1xi32>
    %82 = vector.shape_cast %81 : vector<1xi32> to vector<1x1x1xi32>
    %83 = vector.extract %82[0, 0, 0] : i32 from vector<1x1x1xi32>
    %true_19 = arith.constant true
    %84 = arith.xori %73, %true_19 : i1
    %85 = vector.broadcast %c3_i32 : i32 to vector<1x8xi32>
    %86 = arith.cmpi eq, %1, %85 : vector<1x8xi32>
    %87 = vector.broadcast %84 : i1 to vector<1x8xi1>
    %88 = arith.andi %86, %87 : vector<1x8xi1>
    %89 = vector.broadcast %83 : i32 to vector<1x8xi32>
    %90 = arith.select %88, %89, %67 : vector<1x8xi1>, vector<1x8xi32>
    %91 = arith.index_cast %83 : i32 to index
    %c0_20 = arith.constant 0 : index
    %92 = vector.load %arg2[%91, %c0_20] : memref<512x512xf32, #tpu.memory_space<vmem>>, vector<1x512xf32>
    %93 = arith.addf %71, %92 : vector<1x512xf32>
    %94 = arith.select %84, %93, %71 : vector<1x512xf32>
    %c198_i32_21 = arith.constant 198 : i32
    %95 = arith.cmpi eq, %83, %c198_i32_21 : i32
    %96 = arith.ori %73, %95 : i1
    %c4_i32 = arith.constant 4 : i32
    %cst_22 = arith.constant dense<0xFF800000> : vector<1xf32>
    %97 = vector.multi_reduction <maximumf>, %94, %cst_22 [1] : vector<1x512xf32> to vector<1xf32>
    %98 = vector.shape_cast %97 : vector<1xf32> to vector<1x1xf32>
    %99 = vector.broadcast %98 : vector<1x1xf32> to vector<1x512xf32>
    %100 = arith.cmpf oge, %94, %99 : vector<1x512xf32>
    %c512_i32_23 = arith.constant 512 : i32
    %101 = vector.broadcast %c512_i32_23 : i32 to vector<1x512xi32>
    %102 = arith.select %100, %0, %101 : vector<1x512xi1>, vector<1x512xi32>
    %103 = vector.shape_cast %102 : vector<1x512xi32> to vector<1x1x512xi32>
    %cst_24 = arith.constant dense<2147483647> : vector<1xi32>
    %104 = vector.multi_reduction <minsi>, %103, %cst_24 [1, 2] : vector<1x1x512xi32> to vector<1xi32>
    %105 = vector.shape_cast %104 : vector<1xi32> to vector<1x1x1xi32>
    %106 = vector.extract %105[0, 0, 0] : i32 from vector<1x1x1xi32>
    %true_25 = arith.constant true
    %107 = arith.xori %96, %true_25 : i1
    %108 = vector.broadcast %c4_i32 : i32 to vector<1x8xi32>
    %109 = arith.cmpi eq, %1, %108 : vector<1x8xi32>
    %110 = vector.broadcast %107 : i1 to vector<1x8xi1>
    %111 = arith.andi %109, %110 : vector<1x8xi1>
    %112 = vector.broadcast %106 : i32 to vector<1x8xi32>
    %113 = arith.select %111, %112, %90 : vector<1x8xi1>, vector<1x8xi32>
    %114 = arith.index_cast %106 : i32 to index
    %c0_26 = arith.constant 0 : index
    %115 = vector.load %arg2[%114, %c0_26] : memref<512x512xf32, #tpu.memory_space<vmem>>, vector<1x512xf32>
    %116 = arith.addf %94, %115 : vector<1x512xf32>
    %117 = arith.select %107, %116, %94 : vector<1x512xf32>
    %c198_i32_27 = arith.constant 198 : i32
    %118 = arith.cmpi eq, %106, %c198_i32_27 : i32
    %119 = arith.ori %96, %118 : i1
    %c5_i32 = arith.constant 5 : i32
    %cst_28 = arith.constant dense<0xFF800000> : vector<1xf32>
    %120 = vector.multi_reduction <maximumf>, %117, %cst_28 [1] : vector<1x512xf32> to vector<1xf32>
    %121 = vector.shape_cast %120 : vector<1xf32> to vector<1x1xf32>
    %122 = vector.broadcast %121 : vector<1x1xf32> to vector<1x512xf32>
    %123 = arith.cmpf oge, %117, %122 : vector<1x512xf32>
    %c512_i32_29 = arith.constant 512 : i32
    %124 = vector.broadcast %c512_i32_29 : i32 to vector<1x512xi32>
    %125 = arith.select %123, %0, %124 : vector<1x512xi1>, vector<1x512xi32>
    %126 = vector.shape_cast %125 : vector<1x512xi32> to vector<1x1x512xi32>
    %cst_30 = arith.constant dense<2147483647> : vector<1xi32>
    %127 = vector.multi_reduction <minsi>, %126, %cst_30 [1, 2] : vector<1x1x512xi32> to vector<1xi32>
    %128 = vector.shape_cast %127 : vector<1xi32> to vector<1x1x1xi32>
    %129 = vector.extract %128[0, 0, 0] : i32 from vector<1x1x1xi32>
    %true_31 = arith.constant true
    %130 = arith.xori %119, %true_31 : i1
    %131 = vector.broadcast %c5_i32 : i32 to vector<1x8xi32>
    %132 = arith.cmpi eq, %1, %131 : vector<1x8xi32>
    %133 = vector.broadcast %130 : i1 to vector<1x8xi1>
    %134 = arith.andi %132, %133 : vector<1x8xi1>
    %135 = vector.broadcast %129 : i32 to vector<1x8xi32>
    %136 = arith.select %134, %135, %113 : vector<1x8xi1>, vector<1x8xi32>
    %137 = arith.index_cast %129 : i32 to index
    %c0_32 = arith.constant 0 : index
    %138 = vector.load %arg2[%137, %c0_32] : memref<512x512xf32, #tpu.memory_space<vmem>>, vector<1x512xf32>
    %139 = arith.addf %117, %138 : vector<1x512xf32>
    %140 = arith.select %130, %139, %117 : vector<1x512xf32>
    %c198_i32_33 = arith.constant 198 : i32
    %141 = arith.cmpi eq, %129, %c198_i32_33 : i32
    %142 = arith.ori %119, %141 : i1
    %c6_i32 = arith.constant 6 : i32
    %cst_34 = arith.constant dense<0xFF800000> : vector<1xf32>
    %143 = vector.multi_reduction <maximumf>, %140, %cst_34 [1] : vector<1x512xf32> to vector<1xf32>
    %144 = vector.shape_cast %143 : vector<1xf32> to vector<1x1xf32>
    %145 = vector.broadcast %144 : vector<1x1xf32> to vector<1x512xf32>
    %146 = arith.cmpf oge, %140, %145 : vector<1x512xf32>
    %c512_i32_35 = arith.constant 512 : i32
    %147 = vector.broadcast %c512_i32_35 : i32 to vector<1x512xi32>
    %148 = arith.select %146, %0, %147 : vector<1x512xi1>, vector<1x512xi32>
    %149 = vector.shape_cast %148 : vector<1x512xi32> to vector<1x1x512xi32>
    %cst_36 = arith.constant dense<2147483647> : vector<1xi32>
    %150 = vector.multi_reduction <minsi>, %149, %cst_36 [1, 2] : vector<1x1x512xi32> to vector<1xi32>
    %151 = vector.shape_cast %150 : vector<1xi32> to vector<1x1x1xi32>
    %152 = vector.extract %151[0, 0, 0] : i32 from vector<1x1x1xi32>
    %true_37 = arith.constant true
    %153 = arith.xori %142, %true_37 : i1
    %154 = vector.broadcast %c6_i32 : i32 to vector<1x8xi32>
    %155 = arith.cmpi eq, %1, %154 : vector<1x8xi32>
    %156 = vector.broadcast %153 : i1 to vector<1x8xi1>
    %157 = arith.andi %155, %156 : vector<1x8xi1>
    %158 = vector.broadcast %152 : i32 to vector<1x8xi32>
    %159 = arith.select %157, %158, %136 : vector<1x8xi1>, vector<1x8xi32>
    %160 = arith.index_cast %152 : i32 to index
    %c0_38 = arith.constant 0 : index
    %161 = vector.load %arg2[%160, %c0_38] : memref<512x512xf32, #tpu.memory_space<vmem>>, vector<1x512xf32>
    %162 = arith.addf %140, %161 : vector<1x512xf32>
    %163 = arith.select %153, %162, %140 : vector<1x512xf32>
    %c198_i32_39 = arith.constant 198 : i32
    %164 = arith.cmpi eq, %152, %c198_i32_39 : i32
    %165 = arith.ori %142, %164 : i1
    %c7_i32 = arith.constant 7 : i32
    %cst_40 = arith.constant dense<0xFF800000> : vector<1xf32>
    %166 = vector.multi_reduction <maximumf>, %163, %cst_40 [1] : vector<1x512xf32> to vector<1xf32>
    %167 = vector.shape_cast %166 : vector<1xf32> to vector<1x1xf32>
    %168 = vector.broadcast %167 : vector<1x1xf32> to vector<1x512xf32>
    %169 = arith.cmpf oge, %163, %168 : vector<1x512xf32>
    %c512_i32_41 = arith.constant 512 : i32
    %170 = vector.broadcast %c512_i32_41 : i32 to vector<1x512xi32>
    %171 = arith.select %169, %0, %170 : vector<1x512xi1>, vector<1x512xi32>
    %172 = vector.shape_cast %171 : vector<1x512xi32> to vector<1x1x512xi32>
    %cst_42 = arith.constant dense<2147483647> : vector<1xi32>
    %173 = vector.multi_reduction <minsi>, %172, %cst_42 [1, 2] : vector<1x1x512xi32> to vector<1xi32>
    %174 = vector.shape_cast %173 : vector<1xi32> to vector<1x1x1xi32>
    %175 = vector.extract %174[0, 0, 0] : i32 from vector<1x1x1xi32>
    %true_43 = arith.constant true
    %176 = arith.xori %165, %true_43 : i1
    %177 = vector.broadcast %c7_i32 : i32 to vector<1x8xi32>
    %178 = arith.cmpi eq, %1, %177 : vector<1x8xi32>
    %179 = vector.broadcast %176 : i1 to vector<1x8xi1>
    %180 = arith.andi %178, %179 : vector<1x8xi1>
    %181 = vector.broadcast %175 : i32 to vector<1x8xi32>
    %182 = arith.select %180, %181, %159 : vector<1x8xi1>, vector<1x8xi32>
    %183 = arith.index_cast %175 : i32 to index
    %c0_44 = arith.constant 0 : index
    %184 = vector.load %arg2[%183, %c0_44] : memref<512x512xf32, #tpu.memory_space<vmem>>, vector<1x512xf32>
    %185 = arith.addf %163, %184 : vector<1x512xf32>
    %186 = arith.select %176, %185, %163 : vector<1x512xf32>
    %c198_i32_45 = arith.constant 198 : i32
    %187 = arith.cmpi eq, %175, %c198_i32_45 : i32
    %188 = arith.ori %165, %187 : i1
    %c8_i32 = arith.constant 8 : i32
    %c0_46 = arith.constant 0 : index
    %c0_47 = arith.constant 0 : index
    %c0_48 = arith.constant 0 : index
    %189 = vector.load %arg3[%c0_46, %c0_47, %c0_48] : memref<1x1x8xi32, #tpu.memory_space<vmem>>, vector<1x1x8xi32>
    %190 = vector.shape_cast %189 : vector<1x1x8xi32> to vector<1x8xi32>
    %191 = vector.shape_cast %182 : vector<1x8xi32> to vector<1x1x8xi32>
    tpu.vector_store %arg3[%c0_46, %c0_47, %c0_48], %191 {strides = array<i32>} : memref<1x1x8xi32, #tpu.memory_space<vmem>>, vector<1x1x8xi32>,
    return
  }
  func.func @transform_0(%arg0: i32) -> (i32, i32, i32) {
    %c0_i32 = arith.constant 0 : i32
    %c0_i32_0 = arith.constant 0 : i32
    %c0_i32_1 = arith.constant 0 : i32
    return %arg0, %c0_i32, %c0_i32_0 : i32, i32, i32
  }
  func.func @transform_1(%arg0: i32) -> (i32, i32) {
    %c0_i32 = arith.constant 0 : i32
    %c0_i32_0 = arith.constant 0 : i32
    %c0_i32_1 = arith.constant 0 : i32
    return %c0_i32, %c0_i32_0 : i32, i32
  }
  func.func @transform_2(%arg0: i32) -> (i32, i32, i32) {
    %c0_i32 = arith.constant 0 : i32
    %c0_i32_0 = arith.constant 0 : i32
    %c0_i32_1 = arith.constant 0 : i32
    return %arg0, %c0_i32, %c0_i32_0 : i32, i32, i32
  }
}

</mosaic_0001>

<bundles_post_ra>
// kernel: _decode_call.1
= control target key start
LH: loop header
LB: loop body
LE: loop exit
PB: predicated region body
PF: predicated region fallthrough
CT: control target
= control target key end

     0   :  { %7 = vsyncpa [#allocation3], 0  ;;  %s1988_s0 = inlined_call_operand.hbm [shape: f32[2,1,512], index: 0, kind: input, shape index: {}]   ;;  %s1989_s1 = inlined_call_operand.hbm [shape: f32[512,512], index: 1, kind: input, shape index: {}]   ;;  %s1990_s2 = inlined_call_operand.hbm [shape: s32[2,1,8], index: 2, kind: output, shape index: {}]  }
   0x1   :  { %9 = vsyncpa [#allocation3 + $0x1], 0 }
   0x2   :  { %10 = vsyncpa [#allocation6], 0 }
   0x3   :  { %11 = vsyncpa [#allocation4], 0 }
   0x4   :  { %13 = vsyncpa [#allocation4 + $0x1], 0  ;;  %s1455_s9 = smov 0   ;;  %s1457_s10 = smov 0  }
   0x5   :  { %s1459_s11 = smov 0   ;;  %s1461_s12 = smov 0  }
   0x6 LB: > { %s1476_s13 = sadd.s32 4294967295, %s1432_s12   ;;  %s1187_s14 = sadd.s32 4294967294, %s1432_s12   ;;  %s1432_s12 = sphi %s1461_s12, %s2016_s12   ;;  %s1428_s11 = sphi %s1459_s11, %s2015_s11   ;;  %s1424_s10 = sphi %s1457_s10, %s2014_s10   ;;  %s1420_s9 = sphi %s1455_s9, %s2013_s9  }
   0x7   : > { %p39_p0 = scmp.ne.s32.totalorder %s1424_s10, %s1420_s9  ;;  %p1991_p1 = scmp.eq.s32.totalorder %s1476_s13, 0 }
   0x8   : > { %p90_p3 = scmp.eq.s32.totalorder %s1187_s14, 1  ;;  %p1188_p5 = scmp.ge.s32.totalorder %s1432_s12, 1 }
   0x9   : > { %p1485_p4 = por %p1991_p1, %p39_p0  ;;  %p97_p7 = scmp.lt.s32.totalorder %s1432_s12, 3 }
   0xa   : > { %p1490_p6 = por %p90_p3, %p39_p0  ;;  %s1434_s18 = smov [#allocation5]  }
   0xb   : > { %s1994_s15 = scalar_select %p1485_p4, 1, 0 }
   0xc   : > { %s1995_s16 = scalar_select %p1490_p6, 1, 0 }
   0xd   : > { %p1495_p8 = pnand %p1188_p5, %p97_p7  ;;  %s109_s19 = sshll.u32 %s1434_s18, 4  ;;  %s1499_s19 = int_to_ptr.vmem [resolvable:$true] %s109_s19 }
   0xe   : > { %s1511_s21 = sadd.s32 1, %s1432_s12   ;;  %s26_s22 = sadd.s32 1, %s1428_s11 }
   0xf   : > { %s1996_s17 = scalar_select %p1495_p8, 1, 0 }
  0x10   : > { %p1252_p9 = pneg %p1495_p8  ;;  %s23_s23 = ssub.s32 %s1432_s12, %s1511_s21 }
  0x11   : > { %s1304_s26 = scalar_lea.hbm %s1989_s1, 32768 }
  0x12   : > { %p1506_p11 = pnand %p1252_p9, %p1991_p1  ;;  %p1305_p12 = scmp.ne.s32.totalorder %s1989_s1, %s1304_s26 }
  0x13   : > { %p1311_p5 = scmp.lt.u32.totalorder %s1304_s26, %s1989_s1 }
  0x14   : > { %p1306_p13 = pneg %p1506_p11 }
  0x16   : > { %p1307_p0 = pnand %p1306_p13, %p1305_p12 }
  0x18   : > { %p1308_p3 = pneg %p1307_p0 }
  0x1a   : > { %p1313_p7 = pnand %p1311_p5, %p1308_p3 }
  0x1c   : > { %1316 = shalt.err (!%p1313_p7)
}
  0x1d   : > { %s1317_s3 = scalar_lea.vmem %s1499_s19, 32768  ;;  %p1325_p2 = scmp.lt.s32.totalorder %s1499_s19, %s1499_s19 }
  0x1e   : > { %p1318_p9 = scmp.ne.s32.totalorder %s1499_s19, %s1317_s3  ;;  %p1326_p6 = scmp.lt.s32.totalorder %s1317_s3, %s1317_s3 }
  0x20   : > { %p1320_p10 = pnand %p1318_p9, %p1306_p13  ;;  %p1327_p4 = por %p1326_p6, %p1325_p2 }
  0x22   : > { %p1321_p1 = pneg %p1320_p10 }
  0x24   : > { %p1328_p8 = pnand %p1327_p4, %p1321_p1 }
  0x26   : > { %1331 = shalt.err (!%p1328_p8)
}
  0x27   : > { %s1435_s4 = smov 512   ;;  %s1436_s5 = smov 32  }
  0x28   : > { %1255 = dma.hbm_to_vmem [thread:$0]  (!%p1506_p11), %s1989_s1, 32768, %s1499_s19, [#allocation6], %s1435_s4, %s1435_s4, %s1436_s5  }
  0x29   : > { %p24_p2 = scmp.eq.s32.totalorder %s23_s23, 0  ;;  %p33_p1 = scmp.ne.s32.totalorder %s1428_s11, %s1424_s10 }
  0x2a   : > { %p34_p4 = scmp.eq.s32.totalorder %s1432_s12, 0  ;;  %p1265_p6 = scmp.lt.s32.totalorder %s1432_s12, 2 }
  0x2b   : > { %s1542_s8 = scalar_select %p24_p2, %s1428_s11, %s26_s22  }
  0x2c   : > { %p35_p8 = por %p34_p4, %p33_p1  ;;  %p1998_p10 = scmp.eq.s32.totalorder %s1476_s13, 1 }
  0x2d   : > { %s123_s18 = sand.u32 1, %s1428_s11   ;;  %s1220_s24 = sshll.u32 %s1432_s12, 6 }
  0x2e   : > { %p1546_p12 = por %p1998_p10, %p33_p1  ;;  %s1191_s25 = sshll.u32 %s123_s18, 2 }
  0x2f   : > { %s1555_s27 = scalar_lea.hbm %s1988_s0, %s1220_s24  ;;  %s127_s19 = scalar_lea.vmem [#allocation2], %s1191_s25 }
  0x30   : > { %s135_s22 = sshll.u32 %s127_s19, 4  ;;  %p1557_p11 = pnand %p1265_p6, %p35_p8  ;;  %s1561_s22 = int_to_ptr.vmem [resolvable:$true] %s135_s22 }
  0x31   : > { %s124_s28 = scalar_lea.sflag [#allocation3], %s123_s18  ;;  %s1332_s29 = scalar_lea.hbm %s1555_s27, 64 }
  0x32   : > { %p1333_p13 = scmp.ne.s32.totalorder %s1555_s27, %s1332_s29  ;;  %p1334_p0 = pneg %p1557_p11 }
  0x33   : > { %s1337_s4 = scalar_lea.hbm %s1988_s0, 128  ;;  %p1338_p7 = scmp.lt.u32.totalorder %s1555_s27, %s1988_s0 }
  0x34   : > { %p1335_p3 = pnand %p1334_p0, %p1333_p13  ;;  %p1339_p9 = scmp.lt.u32.totalorder %s1337_s4, %s1332_s29 }
  0x35   : > { %p1341_p1 = scmp.lt.u32.totalorder %s1332_s29, %s1555_s27 }
  0x36   : > { %p1336_p5 = pneg %p1335_p3  ;;  %p1340_p2 = por %p1339_p9, %p1338_p7 }
  0x38   : > { %p1342_p4 = por %p1341_p1, %p1340_p2 }
  0x3a   : > { %p1343_p6 = pnand %p1342_p4, %p1336_p5 }
  0x3c   : > { %1346 = shalt.err (!%p1343_p6)
}
  0x3d   : > { %s1347_s7 = scalar_lea.vmem %s1561_s22, 64  ;;  %s1437_s18 = smov [#allocation2]  }
  0x3e   : > { %p1348_p8 = scmp.ne.s32.totalorder %s1561_s22, %s1347_s7  ;;  %s1352_s24 = sshll.u32 %s1437_s18, 4  ;;  %s1353_s24 = int_to_ptr.vmem [resolvable:$false] %s1352_s24 }
  0x3f   : > { %s1354_s25 = scalar_lea.vmem %s1353_s24, 128  ;;  %p1355_p3 = scmp.lt.s32.totalorder %s1561_s22, %s1353_s24 }
  0x40   : > { %p1350_p10 = pnand %p1348_p8, %p1334_p0  ;;  %p1356_p7 = scmp.lt.s32.totalorder %s1354_s25, %s1347_s7 }
  0x42   : > { %p1351_p13 = pneg %p1350_p10  ;;  %p1357_p9 = por %p1356_p7, %p1355_p3 }
  0x44   : > { %p1358_p2 = pnand %p1357_p9, %p1351_p13 }
  0x46   : > { %1361 = shalt.err (!%p1358_p2)
}
  0x47   : > { %1259 = dma.hbm_to_vmem [thread:$0]  (!%p1557_p11), %s1555_s27, 64, %s1561_s22, %s124_s28  }
  0x48   : > { %p2001_p5 = scmp.ne.s32.totalorder %s1996_s17, 0 }
  0x49   : > { %s1591_s20 = sand.u32 (!%p2001_p5), 1, %s1424_s10   ;;  %p2002_p0 = scmp.ne.s32.totalorder (!%p2001_p5), %s1994_s15, 0 }
  0x4a   : > { %144 = sbr.rel (%p2001_p5) target bundleno = 4298 (0x10ca), region = 28  ;;  %s1195_s26 = sshll.u32 (!%p2001_p5), %s1591_s20, 2 }
  0x4b   : > { %s147_s19 = scalar_lea.sflag (!%p2001_p5), [#allocation3], %s1591_s20  ;;  %s150_s29 = scalar_lea.vmem (!%p2001_p5), [#allocation2], %s1195_s26 }
  0x51   : > { %1407 = dma.done.wait (%p2002_p0), %s147_s19, 64  }
  0x52   : > { %1409 = vsyncadd (%p2002_p0), %s147_s19, 4294967232  ;;  %p2003_p1 = scmp.eq.s32.totalorder %s1476_s13, 0 }
  0x54   : > { %1411 = dma.done.wait (%p2003_p1), [#allocation6], 32768   ;;  %p2004_p11 = pmov %p2003_p1 }
  0x55   : > { %v174_v0 = vlaneseq  ;;  %v1611_v6 = vld [vmem:[%s150_s29] sm:$0xf]  ;;  %vm201_vm0 = vcmask 1040384   ;;  %v1438_v19 = vmov 1966171168  }
  0x56   : > { %1413 = vsyncadd (%p2004_p11), [#allocation6], 4294934528  ;;  %v221_v20 = vunpack.c.l.s4 %v1438_v19 }
  0x57   : > { %v182_v1 = vshrl.u32 %v174_v0, 7  ;;  %v1625_v18 = vand.u32 127, %v174_v0 }
  0x58   : > { %v222_v24 = vunpack.c.0.s8 %v221_v20 }
  0x59   : > { %v1603_v2 = vsub.s32 0, %v182_v1  ;;  %v1605_v3 = vsub.s32 1, %v182_v1  ;;  %v1607_v4 = vsub.s32 2, %v182_v1  ;;  %v1609_v5 = vsub.s32 3, %v182_v1 }
  0x5a   : > { %v176_v21 = vadd.s32 128, %v1625_v18  ;;  %v177_v22 = vadd.s32 256, %v1625_v18  ;;  %v178_v23 = vadd.s32 384, %v1625_v18  ;;  %v225_v27 = vsub.s32 %v222_v24, %v182_v1 }
  0x5b   : > { %v184_v7 = vrot.slane %v1611_v6, %v1603_v2  ;;  %v188_v8 = vrot.slane %v1611_v6, %v1605_v3  ;;  %v192_v9 = vrot.slane %v1611_v6, %v1607_v4  ;;  %v196_v10 = vrot.slane %v1611_v6, %v1609_v5 }
  0x5c   : > { %v218_v25 = vcombine.low %v1625_v18, %v176_v21  ;;  %v219_v26 = vcombine.low %v177_v22, %v178_v23 }
  0x5d   : > { %v202_v11 = vsel %vm201_vm0, %v184_v7, -inf  ;;  %v203_v12 = vsel %vm201_vm0, %v188_v8, -inf  ;;  %v204_v13 = vsel %vm201_vm0, %v192_v9, -inf  ;;  %v205_v14 = vsel %vm201_vm0, %v196_v10, -inf }
  0x5e   : > { %v206_v15 = vmax.f32 %v202_v11, %v203_v12  ;;  %v207_v16 = vmax.f32 %v204_v13, %v205_v14  ;;  %v226_v28 = vrot.slane %v218_v25, %v225_v27  ;;  %v233_v29 = vrot.slane %v219_v26, %v225_v27 }
  0x60   : > { %v208_v17 = vmax.f32 %v206_v15, %v207_v16  ;;  %v234_v30 = vcombine.low %v226_v28, %v233_v29 }
  0x62   : > { %209 = vmax.xlane.f32.xlu0 %v208_v17  ;;  %v1631_v31 = vrot.slane %v234_v30, %v225_v27 }
  0xef   : > { %v210_v32 = vpop.xlane.xlu0 %209 }
  0xf0   : > { %v215_v33 = vrot.slane %v210_v32, %v1603_v2 }
  0xf2   : > { %vm217_vm1 = vcmp.ge.f32.partialorder %v1611_v6, %v215_v33 }
  0xf3   : > { %v242_v34 = vsel %vm217_vm1, %v1631_v31, 512 }
  0xf4   : > { %v246_v35 = vrot.slane %v242_v34, %v1603_v2  ;;  %v250_v36 = vrot.slane %v242_v34, %v1605_v3  ;;  %v254_v37 = vrot.slane %v242_v34, %v1607_v4  ;;  %v258_v38 = vrot.slane %v242_v34, %v1609_v5 }
  0xf6   : > { %v259_v39 = vsel %vm201_vm0, %v246_v35, 2147483647  ;;  %v260_v40 = vsel %vm201_vm0, %v250_v36, 2147483647  ;;  %v261_v41 = vsel %vm201_vm0, %v254_v37, 2147483647 }
  0xf7   : > { %v262_v42 = vsel %vm201_vm0, %v258_v38, 2147483647  ;;  %vm263_vm2 = vcmp.lt.s32.totalorder %v259_v39, %v260_v40 }
  0xf8   : > { %v264_v43 = vsel %vm263_vm2, %v259_v39, %v260_v40  ;;  %vm265_vm3 = vcmp.lt.s32.totalorder %v261_v41, %v262_v42 }
  0xf9   : > { %v266_v44 = vsel %vm265_vm3, %v261_v41, %v262_v42 }
  0xfa   : > { %vm267_vm4 = vcmp.lt.s32.totalorder %v264_v43, %v266_v44 }
  0xfb   : > { %v268_v45 = vsel %vm267_vm4, %v264_v43, %v266_v44 }
  0xfc   : > { %v270_v46 = vshra.s32 %v268_v45, 16  ;;  %v269_v48 = vand.u32 65535, %v268_v45 }
  0xfe   : > { %v272_v47 = vcvt.s32.f32 %v270_v46  ;;  %v271_v50 = vcvt.s32.f32 %v269_v48 }
 0x100   : > { %273 = vmin.xlane.f32.xlu0 %v272_v47 }
 0x18d   : > { %v274_v49 = vpop.xlane.xlu0 %273 }
 0x18e   : > { %vm275_vm5 = vcmp.eq.f32.partialorder %v272_v47, %v274_v49  ;;  %v280_v52 = vcvt.f32.s32 %v274_v49 }
 0x18f   : > { %v276_v51 = vsel %vm275_vm5, %v271_v50, inf }
 0x190   : > { %277 = vmin.xlane.f32.xlu1 %v276_v51  ;;  %v281_v54 = vshll.u32 %v280_v52, 16 }
 0x21d   : > { %v278_v53 = vpop.xlane.xlu1 %277 }
 0x21e   : > { %v279_v55 = vcvt.f32.s32 %v278_v53 }
 0x220   : > { %v282_v56 = vadd.s32 %v281_v54, %v279_v55 }
 0x222   : > { %v283_v57 = vrot.slane %v282_v56, 4 }
 0x224   : > { %vm284_vm6 = vcmp.lt.s32.totalorder %v282_v56, %v283_v57 }
 0x225   : > { %v285_v58 = vsel %vm284_vm6, %v282_v56, %v283_v57 }
 0x226   : > { %v286_v59 = vrot.slane %v285_v58, 2 }
 0x228   : > { %vm287_vm7 = vcmp.lt.s32.totalorder %v285_v58, %v286_v59 }
 0x229   : > { %v288_v60 = vsel %vm287_vm7, %v285_v58, %v286_v59 }
 0x22a   : > { %v289_v61 = vrot.slane %v288_v60, 1 }
 0x22c   : > { %vm290_vm8 = vcmp.lt.s32.totalorder %v288_v60, %v289_v61 }
 0x22d   : > { %v291_v62 = vsel %vm290_vm8, %v288_v60, %v289_v61 }
 0x22e   : > { %1228 = vpush %v291_v62 }
 0x25f   : > { %s1644_s15 = spop %1228 }
 0x260   : > { %s296_s17 = sshra.s32 %s1644_s15, 3  ;;  %s299_s27 = sand.u32 7, %s1644_s15 }
 0x261   : > { %s1221_s22 = sshll.u32 %s296_s17, 5  ;;  %p306_p4 = scmp.eq.s32.totalorder %s1644_s15, 198 }
 0x262   : > { %s302_s23 = sadd.s32 %s1221_s22, %s299_s27  ;;  %p395_p1 = scmp.ne.s32.totalorder %s1644_s15, 198 }
 0x263   : > { %s303_s28 = scalar_lea.vmem [#allocation5], %s302_s23 }
 0x264   : > { %v304_v63 = vld [vmem:[%s303_s28] ss:$8 sm:$0xf]  ;;  %s413_s30 = scalar_select %p306_p4, 1, 0 }
 0x265   : > { %v1649_v0 = vadd.f32 %v304_v63, %v1611_v6 }
 0x266   : > { %v414_v49 = vstv %s413_s30 }
 0x267   : > { %v311_v1 = vrot.slane %v1649_v0, %v1603_v2  ;;  %v315_v7 = vrot.slane %v1649_v0, %v1605_v3  ;;  %v319_v8 = vrot.slane %v1649_v0, %v1607_v4  ;;  %v323_v9 = vrot.slane %v1649_v0, %v1609_v5 }
 0x268   : > { %vm415_vm2 = vcmp.eq.s32.totalorder %v414_v49, 1 }
 0x269   : > { %v328_v10 = vsel %vm201_vm0, %v311_v1, -inf  ;;  %v329_v11 = vsel %vm201_vm0, %v315_v7, -inf  ;;  %v330_v12 = vsel %vm201_vm0, %v319_v8, -inf  ;;  %v331_v6 = vsel %vm201_vm0, %v323_v9, -inf }
 0x26a   : > { %v332_v13 = vmax.f32 %v328_v10, %v329_v11  ;;  %v333_v14 = vmax.f32 %v330_v12, %v331_v6 }
 0x26c   : > { %v334_v15 = vmax.f32 %v332_v13, %v333_v14 }
 0x26e   : > { %335 = vmax.xlane.f32.xlu1 %v334_v15 }
 0x2fb   : > { %v336_v16 = vpop.xlane.xlu1 %335 }
 0x2fc   : > { %v341_v17 = vrot.slane %v336_v16, %v1603_v2 }
 0x2fe   : > { %vm343_vm9 = vcmp.ge.f32.partialorder %v1649_v0, %v341_v17 }
 0x2ff   : > { %v344_v19 = vsel %vm343_vm9, %v1631_v31, 512 }
 0x300   : > { %v348_v20 = vrot.slane %v344_v19, %v1603_v2  ;;  %v352_v21 = vrot.slane %v344_v19, %v1605_v3  ;;  %v356_v22 = vrot.slane %v344_v19, %v1607_v4  ;;  %v360_v23 = vrot.slane %v344_v19, %v1609_v5 }
 0x302   : > { %v361_v24 = vsel %vm201_vm0, %v348_v20, 2147483647  ;;  %v362_v25 = vsel %vm201_vm0, %v352_v21, 2147483647  ;;  %v363_v26 = vsel %vm201_vm0, %v356_v22, 2147483647 }
 0x303   : > { %v364_v27 = vsel %vm201_vm0, %v360_v23, 2147483647  ;;  %vm365_vm10 = vcmp.lt.s32.totalorder %v361_v24, %v362_v25 }
 0x304   : > { %v366_v28 = vsel %vm365_vm10, %v361_v24, %v362_v25  ;;  %vm367_vm11 = vcmp.lt.s32.totalorder %v363_v26, %v364_v27 }
 0x305   : > { %v368_v29 = vsel %vm367_vm11, %v363_v26, %v364_v27 }
 0x306   : > { %vm369_vm12 = vcmp.lt.s32.totalorder %v366_v28, %v368_v29 }
 0x307   : > { %v370_v30 = vsel %vm369_vm12, %v366_v28, %v368_v29 }
 0x308   : > { %v372_v32 = vshra.s32 %v370_v30, 16  ;;  %v371_v34 = vand.u32 65535, %v370_v30 }
 0x30a   : > { %v374_v33 = vcvt.s32.f32 %v372_v32  ;;  %v373_v36 = vcvt.s32.f32 %v371_v34 }
 0x30c   : > { %375 = vmin.xlane.f32.xlu0 %v374_v33 }
 0x399   : > { %v376_v35 = vpop.xlane.xlu0 %375 }
 0x39a   : > { %vm377_vm13 = vcmp.eq.f32.partialorder %v374_v33, %v376_v35  ;;  %v382_v38 = vcvt.f32.s32 %v376_v35 }
 0x39b   : > { %v378_v37 = vsel %vm377_vm13, %v373_v36, inf }
 0x39c   : > { %379 = vmin.xlane.f32.xlu1 %v378_v37  ;;  %v383_v40 = vshll.u32 %v382_v38, 16 }
 0x429   : > { %v380_v39 = vpop.xlane.xlu1 %379 }
 0x42a   : > { %v381_v41 = vcvt.f32.s32 %v380_v39 }
 0x42c   : > { %v384_v42 = vadd.s32 %v383_v40, %v381_v41 }
 0x42e   : > { %v385_v43 = vrot.slane %v384_v42, 4 }
 0x430   : > { %vm386_vm14 = vcmp.lt.s32.totalorder %v384_v42, %v385_v43 }
 0x431   : > { %v387_v44 = vsel %vm386_vm14, %v384_v42, %v385_v43 }
 0x432   : > { %v388_v45 = vrot.slane %v387_v44, 2 }
 0x434   : > { %vm389_vm15 = vcmp.lt.s32.totalorder %v387_v44, %v388_v45 }
 0x435   : > { %v390_v46 = vsel %vm389_vm15, %v387_v44, %v388_v45 }
 0x436   : > { %v391_v47 = vrot.slane %v390_v46, 1 }
 0x438   : > { %vm392_vm1 = vcmp.lt.s32.totalorder %v390_v46, %v391_v47 }
 0x439   : > { %v393_v48 = vsel %vm392_vm1, %v390_v46, %v391_v47 }
 0x43a   : > { %1230 = vpush %v393_v48 }
 0x46b   : > { %s1677_s3 = spop %1230 }
 0x46c   : > { %s403_s4 = sshra.s32 %s1677_s3, 3  ;;  %s406_s5 = sand.u32 7, %s1677_s3 }
 0x46d   : > { %s1222_s6 = sshll.u32 %s403_s4, 5  ;;  %p417_p6 = scmp.eq.s32.totalorder %s1677_s3, 198 }
 0x46e   : > { %s409_s7 = sadd.s32 %s1222_s6, %s406_s5 }
 0x46f   : > { %s410_s18 = scalar_lea.vmem [#allocation5], %s409_s7  ;;  %p1711_p8 = por %p417_p6, %p306_p4 }
 0x470   : > { %v411_v50 = vld [vmem:[%s410_s18] ss:$8 sm:$0xf] }
 0x471   : > { %v412_v51 = vadd.f32 %v411_v50, %v1649_v0  ;;  %s525_s25 = scalar_select %p1711_p8, 1, 0 }
 0x473   : > { %v1683_v52 = vsel %vm415_vm2, %v1649_v0, %v412_v51  ;;  %v526_v37 = vstv %s525_s25 }
 0x474   : > { %v423_v53 = vrot.slane %v1683_v52, %v1603_v2  ;;  %v427_v54 = vrot.slane %v1683_v52, %v1605_v3  ;;  %v431_v55 = vrot.slane %v1683_v52, %v1607_v4  ;;  %v435_v56 = vrot.slane %v1683_v52, %v1609_v5 }
 0x475   : > { %vm527_vm11 = vcmp.eq.s32.totalorder %v526_v37, 1 }
 0x476   : > { %v440_v57 = vsel %vm201_vm0, %v423_v53, -inf  ;;  %v441_v58 = vsel %vm201_vm0, %v427_v54, -inf  ;;  %v442_v59 = vsel %vm201_vm0, %v431_v55, -inf  ;;  %v443_v60 = vsel %vm201_vm0, %v435_v56, -inf }
 0x477   : > { %v444_v61 = vmax.f32 %v440_v57, %v441_v58  ;;  %v445_v62 = vmax.f32 %v442_v59, %v443_v60 }
 0x479   : > { %v446_v63 = vmax.f32 %v444_v61, %v445_v62 }
 0x47b   : > { %447 = vmax.xlane.f32.xlu0 %v446_v63 }
 0x508   : > { %v448_v0 = vpop.xlane.xlu0 %447 }
 0x509   : > { %v453_v1 = vrot.slane %v448_v0, %v1603_v2 }
 0x50b   : > { %vm455_vm3 = vcmp.ge.f32.partialorder %v1683_v52, %v453_v1 }
 0x50c   : > { %v456_v7 = vsel %vm455_vm3, %v1631_v31, 512 }
 0x50d   : > { %v460_v8 = vrot.slane %v456_v7, %v1603_v2  ;;  %v464_v9 = vrot.slane %v456_v7, %v1605_v3  ;;  %v468_v10 = vrot.slane %v456_v7, %v1607_v4  ;;  %v472_v11 = vrot.slane %v456_v7, %v1609_v5 }
 0x50f   : > { %v473_v12 = vsel %vm201_vm0, %v460_v8, 2147483647  ;;  %v474_v6 = vsel %vm201_vm0, %v464_v9, 2147483647  ;;  %v475_v13 = vsel %vm201_vm0, %v468_v10, 2147483647 }
 0x510   : > { %v476_v14 = vsel %vm201_vm0, %v472_v11, 2147483647  ;;  %vm477_vm4 = vcmp.lt.s32.totalorder %v473_v12, %v474_v6 }
 0x511   : > { %v478_v15 = vsel %vm477_vm4, %v473_v12, %v474_v6  ;;  %vm479_vm5 = vcmp.lt.s32.totalorder %v475_v13, %v476_v14 }
 0x512   : > { %v480_v16 = vsel %vm479_vm5, %v475_v13, %v476_v14 }
 0x513   : > { %vm481_vm6 = vcmp.lt.s32.totalorder %v478_v15, %v480_v16 }
 0x514   : > { %v482_v17 = vsel %vm481_vm6, %v478_v15, %v480_v16 }
 0x515   : > { %v484_v19 = vshra.s32 %v482_v17, 16  ;;  %v483_v21 = vand.u32 65535, %v482_v17 }
 0x517   : > { %v486_v20 = vcvt.s32.f32 %v484_v19  ;;  %v485_v23 = vcvt.s32.f32 %v483_v21 }
 0x519   : > { %487 = vmin.xlane.f32.xlu1 %v486_v20 }
 0x5a6   : > { %v488_v22 = vpop.xlane.xlu1 %487 }
 0x5a7   : > { %vm489_vm7 = vcmp.eq.f32.partialorder %v486_v20, %v488_v22  ;;  %v494_v25 = vcvt.f32.s32 %v488_v22 }
 0x5a8   : > { %v490_v24 = vsel %vm489_vm7, %v485_v23, inf }
 0x5a9   : > { %491 = vmin.xlane.f32.xlu0 %v490_v24  ;;  %v495_v27 = vshll.u32 %v494_v25, 16 }
 0x636   : > { %v492_v26 = vpop.xlane.xlu0 %491 }
 0x637   : > { %v493_v28 = vcvt.f32.s32 %v492_v26 }
 0x639   : > { %v496_v29 = vadd.s32 %v495_v27, %v493_v28 }
 0x63b   : > { %v497_v30 = vrot.slane %v496_v29, 4 }
 0x63d   : > { %vm498_vm8 = vcmp.lt.s32.totalorder %v496_v29, %v497_v30 }
 0x63e   : > { %v499_v32 = vsel %vm498_vm8, %v496_v29, %v497_v30 }
 0x63f   : > { %v500_v33 = vrot.slane %v499_v32, 2 }
 0x641   : > { %vm501_vm9 = vcmp.lt.s32.totalorder %v499_v32, %v500_v33 }
 0x642   : > { %v502_v34 = vsel %vm501_vm9, %v499_v32, %v500_v33 }
 0x643   : > { %v503_v35 = vrot.slane %v502_v34, 1 }
 0x645   : > { %vm504_vm10 = vcmp.lt.s32.totalorder %v502_v34, %v503_v35 }
 0x646   : > { %v505_v36 = vsel %vm504_vm10, %v502_v34, %v503_v35 }
 0x647   : > { %1232 = vpush %v505_v36 }
 0x678   : > { %s1717_s26 = spop %1232 }
 0x679   : > { %s515_s19 = sshra.s32 %s1717_s26, 3  ;;  %s518_s29 = sand.u32 7, %s1717_s26 }
 0x67a   : > { %s1223_s17 = sshll.u32 %s515_s19, 5  ;;  %p529_p10 = scmp.eq.s32.totalorder %s1717_s26, 198 }
 0x67b   : > { %s521_s27 = sadd.s32 %s1223_s17, %s518_s29 }
 0x67c   : > { %s522_s22 = scalar_lea.vmem [#allocation5], %s521_s27  ;;  %p1751_p13 = por %p529_p10, %p1711_p8 }
 0x67d   : > { %v523_v38 = vld [vmem:[%s522_s22] ss:$8 sm:$0xf] }
 0x67e   : > { %v524_v39 = vadd.f32 %v523_v38, %v1683_v52  ;;  %s637_s28 = scalar_select %p1751_p13, 1, 0 }
 0x680   : > { %v1723_v40 = vsel %vm527_vm11, %v1683_v52, %v524_v39  ;;  %v638_v24 = vstv %s637_s28 }
 0x681   : > { %v535_v41 = vrot.slane %v1723_v40, %v1603_v2  ;;  %v539_v42 = vrot.slane %v1723_v40, %v1605_v3  ;;  %v543_v43 = vrot.slane %v1723_v40, %v1607_v4  ;;  %v547_v44 = vrot.slane %v1723_v40, %v1609_v5 }
 0x682   : > { %vm639_vm5 = vcmp.eq.s32.totalorder %v638_v24, 1 }
 0x683   : > { %v552_v45 = vsel %vm201_vm0, %v535_v41, -inf  ;;  %v553_v46 = vsel %vm201_vm0, %v539_v42, -inf  ;;  %v554_v47 = vsel %vm201_vm0, %v543_v43, -inf  ;;  %v555_v48 = vsel %vm201_vm0, %v547_v44, -inf }
 0x684   : > { %v556_v49 = vmax.f32 %v552_v45, %v553_v46  ;;  %v557_v50 = vmax.f32 %v554_v47, %v555_v48 }
 0x686   : > { %v558_v51 = vmax.f32 %v556_v49, %v557_v50 }
 0x688   : > { %559 = vmax.xlane.f32.xlu1 %v558_v51 }
 0x715   : > { %v560_v52 = vpop.xlane.xlu1 %559 }
 0x716   : > { %v565_v53 = vrot.slane %v560_v52, %v1603_v2 }
 0x718   : > { %vm567_vm12 = vcmp.ge.f32.partialorder %v1723_v40, %v565_v53 }
 0x719   : > { %v568_v54 = vsel %vm567_vm12, %v1631_v31, 512 }
 0x71a   : > { %v572_v55 = vrot.slane %v568_v54, %v1603_v2  ;;  %v576_v56 = vrot.slane %v568_v54, %v1605_v3  ;;  %v580_v57 = vrot.slane %v568_v54, %v1607_v4  ;;  %v584_v58 = vrot.slane %v568_v54, %v1609_v5 }
 0x71c   : > { %v585_v59 = vsel %vm201_vm0, %v572_v55, 2147483647  ;;  %v586_v60 = vsel %vm201_vm0, %v576_v56, 2147483647  ;;  %v587_v61 = vsel %vm201_vm0, %v580_v57, 2147483647 }
 0x71d   : > { %v588_v62 = vsel %vm201_vm0, %v584_v58, 2147483647  ;;  %vm589_vm13 = vcmp.lt.s32.totalorder %v585_v59, %v586_v60 }
 0x71e   : > { %v590_v63 = vsel %vm589_vm13, %v585_v59, %v586_v60  ;;  %vm591_vm14 = vcmp.lt.s32.totalorder %v587_v61, %v588_v62 }
 0x71f   : > { %v592_v0 = vsel %vm591_vm14, %v587_v61, %v588_v62 }
 0x720   : > { %vm593_vm15 = vcmp.lt.s32.totalorder %v590_v63, %v592_v0 }
 0x721   : > { %v594_v1 = vsel %vm593_vm15, %v590_v63, %v592_v0 }
 0x722   : > { %v596_v7 = vshra.s32 %v594_v1, 16  ;;  %v595_v9 = vand.u32 65535, %v594_v1 }
 0x724   : > { %v598_v8 = vcvt.s32.f32 %v596_v7  ;;  %v597_v11 = vcvt.s32.f32 %v595_v9 }
 0x726   : > { %599 = vmin.xlane.f32.xlu0 %v598_v8 }
 0x7b3   : > { %v600_v10 = vpop.xlane.xlu0 %599 }
 0x7b4   : > { %vm601_vm1 = vcmp.eq.f32.partialorder %v598_v8, %v600_v10  ;;  %v606_v6 = vcvt.f32.s32 %v600_v10 }
 0x7b5   : > { %v602_v12 = vsel %vm601_vm1, %v597_v11, inf }
 0x7b6   : > { %603 = vmin.xlane.f32.xlu1 %v602_v12  ;;  %v607_v14 = vshll.u32 %v606_v6, 16 }
 0x843   : > { %v604_v13 = vpop.xlane.xlu1 %603 }
 0x844   : > { %v605_v15 = vcvt.f32.s32 %v604_v13 }
 0x846   : > { %v608_v16 = vadd.s32 %v607_v14, %v605_v15 }
 0x848   : > { %v609_v17 = vrot.slane %v608_v16, 4 }
 0x84a   : > { %vm610_vm2 = vcmp.lt.s32.totalorder %v608_v16, %v609_v17 }
 0x84b   : > { %v611_v19 = vsel %vm610_vm2, %v608_v16, %v609_v17 }
 0x84c   : > { %v612_v20 = vrot.slane %v611_v19, 2 }
 0x84e   : > { %vm613_vm3 = vcmp.lt.s32.totalorder %v611_v19, %v612_v20 }
 0x84f   : > { %v614_v21 = vsel %vm613_vm3, %v611_v19, %v612_v20 }
 0x850   : > { %v615_v22 = vrot.slane %v614_v21, 1 }
 0x852   : > { %vm616_vm4 = vcmp.lt.s32.totalorder %v614_v21, %v615_v22 }
 0x853   : > { %v617_v23 = vsel %vm616_vm4, %v614_v21, %v615_v22 }
 0x854   : > { %1234 = vpush %v617_v23 }
 0x885   : > { %s1757_s30 = spop %1234 }
 0x886   : > { %s627_s4 = sshra.s32 %s1757_s30, 3  ;;  %s630_s5 = sand.u32 7, %s1757_s30 }
 0x887   : > { %s1224_s6 = sshll.u32 %s627_s4, 5  ;;  %p641_p3 = scmp.eq.s32.totalorder %s1757_s30, 198 }
 0x888   : > { %s633_s7 = sadd.s32 %s1224_s6, %s630_s5  ;;  %s1078_s5 = scalar_lea.sflag [#allocation4], %s1591_s20 }
 0x889   : > { %s634_s18 = scalar_lea.vmem [#allocation5], %s633_s7  ;;  %p1791_p7 = por %p641_p3, %p1751_p13 }
 0x88a   : > { %v635_v25 = vld [vmem:[%s634_s18] ss:$8 sm:$0xf] }
 0x88b   : > { %v636_v26 = vadd.f32 %v635_v25, %v1723_v40  ;;  %s749_s19 = scalar_select %p1791_p7, 1, 0 }
 0x88d   : > { %v1763_v27 = vsel %vm639_vm5, %v1723_v40, %v636_v26  ;;  %v750_v12 = vstv %s749_s19 }
 0x88e   : > { %v647_v28 = vrot.slane %v1763_v27, %v1603_v2  ;;  %v651_v29 = vrot.slane %v1763_v27, %v1605_v3  ;;  %v655_v30 = vrot.slane %v1763_v27, %v1607_v4  ;;  %v659_v32 = vrot.slane %v1763_v27, %v1609_v5 }
 0x88f   : > { %vm751_vm14 = vcmp.eq.s32.totalorder %v750_v12, 1 }
 0x890   : > { %v664_v33 = vsel %vm201_vm0, %v647_v28, -inf  ;;  %v665_v34 = vsel %vm201_vm0, %v651_v29, -inf  ;;  %v666_v35 = vsel %vm201_vm0, %v655_v30, -inf  ;;  %v667_v36 = vsel %vm201_vm0, %v659_v32, -inf }
 0x891   : > { %v668_v37 = vmax.f32 %v664_v33, %v665_v34  ;;  %v669_v38 = vmax.f32 %v666_v35, %v667_v36 }
 0x893   : > { %v670_v39 = vmax.f32 %v668_v37, %v669_v38 }
 0x895   : > { %671 = vmax.xlane.f32.xlu0 %v670_v39 }
 0x922   : > { %v672_v40 = vpop.xlane.xlu0 %671 }
 0x923   : > { %v677_v41 = vrot.slane %v672_v40, %v1603_v2 }
 0x925   : > { %vm679_vm6 = vcmp.ge.f32.partialorder %v1763_v27, %v677_v41 }
 0x926   : > { %v680_v42 = vsel %vm679_vm6, %v1631_v31, 512 }
 0x927   : > { %v684_v43 = vrot.slane %v680_v42, %v1603_v2  ;;  %v688_v44 = vrot.slane %v680_v42, %v1605_v3  ;;  %v692_v45 = vrot.slane %v680_v42, %v1607_v4  ;;  %v696_v46 = vrot.slane %v680_v42, %v1609_v5 }
 0x929   : > { %v697_v47 = vsel %vm201_vm0, %v684_v43, 2147483647  ;;  %v698_v48 = vsel %vm201_vm0, %v688_v44, 2147483647  ;;  %v699_v49 = vsel %vm201_vm0, %v692_v45, 2147483647 }
 0x92a   : > { %v700_v50 = vsel %vm201_vm0, %v696_v46, 2147483647  ;;  %vm701_vm7 = vcmp.lt.s32.totalorder %v697_v47, %v698_v48 }
 0x92b   : > { %v702_v51 = vsel %vm701_vm7, %v697_v47, %v698_v48  ;;  %vm703_vm8 = vcmp.lt.s32.totalorder %v699_v49, %v700_v50 }
 0x92c   : > { %v704_v52 = vsel %vm703_vm8, %v699_v49, %v700_v50 }
 0x92d   : > { %vm705_vm9 = vcmp.lt.s32.totalorder %v702_v51, %v704_v52 }
 0x92e   : > { %v706_v53 = vsel %vm705_vm9, %v702_v51, %v704_v52 }
 0x92f   : > { %v708_v54 = vshra.s32 %v706_v53, 16  ;;  %v707_v56 = vand.u32 65535, %v706_v53 }
 0x931   : > { %v710_v55 = vcvt.s32.f32 %v708_v54  ;;  %v709_v58 = vcvt.s32.f32 %v707_v56 }
 0x933   : > { %711 = vmin.xlane.f32.xlu1 %v710_v55 }
 0x9c0   : > { %v712_v57 = vpop.xlane.xlu1 %711 }
 0x9c1   : > { %vm713_vm10 = vcmp.eq.f32.partialorder %v710_v55, %v712_v57  ;;  %v718_v60 = vcvt.f32.s32 %v712_v57 }
 0x9c2   : > { %v714_v59 = vsel %vm713_vm10, %v709_v58, inf }
 0x9c3   : > { %715 = vmin.xlane.f32.xlu0 %v714_v59  ;;  %v719_v62 = vshll.u32 %v718_v60, 16 }
 0xa50   : > { %v716_v61 = vpop.xlane.xlu0 %715 }
 0xa51   : > { %v717_v63 = vcvt.f32.s32 %v716_v61 }
 0xa53   : > { %v720_v0 = vadd.s32 %v719_v62, %v717_v63 }
 0xa55   : > { %v721_v1 = vrot.slane %v720_v0, 4 }
 0xa57   : > { %vm722_vm11 = vcmp.lt.s32.totalorder %v720_v0, %v721_v1 }
 0xa58   : > { %v723_v7 = vsel %vm722_vm11, %v720_v0, %v721_v1 }
 0xa59   : > { %v724_v8 = vrot.slane %v723_v7, 2 }
 0xa5b   : > { %vm725_vm12 = vcmp.lt.s32.totalorder %v723_v7, %v724_v8 }
 0xa5c   : > { %v726_v9 = vsel %vm725_vm12, %v723_v7, %v724_v8 }
 0xa5d   : > { %v727_v10 = vrot.slane %v726_v9, 1 }
 0xa5f   : > { %vm728_vm13 = vcmp.lt.s32.totalorder %v726_v9, %v727_v10 }
 0xa60   : > { %v729_v11 = vsel %vm728_vm13, %v726_v9, %v727_v10 }
 0xa61   : > { %1236 = vpush %v729_v11 }
 0xa92   : > { %s1797_s29 = spop %1236 }
 0xa93   : > { %s739_s17 = sshra.s32 %s1797_s29, 3  ;;  %s742_s27 = sand.u32 7, %s1797_s29 }
 0xa94   : > { %s1225_s22 = sshll.u32 %s739_s17, 5  ;;  %p753_p9 = scmp.eq.s32.totalorder %s1797_s29, 198 }
 0xa95   : > { %s745_s28 = sadd.s32 %s1225_s22, %s742_s27 }
 0xa96   : > { %s746_s4 = scalar_lea.vmem [#allocation5], %s745_s28  ;;  %p1831_p2 = por %p753_p9, %p1791_p7 }
 0xa97   : > { %v747_v6 = vld [vmem:[%s746_s4] ss:$8 sm:$0xf]  ;;  %s1439_s28 = smov [#allocation7]  }
 0xa98   : > { %v748_v13 = vadd.f32 %v747_v6, %v1763_v27  ;;  %s861_s6 = scalar_select %p1831_p2, 1, 0 }
 0xa9a   : > { %v1803_v14 = vsel %vm751_vm14, %v1763_v27, %v748_v13  ;;  %v862_v59 = vstv %s861_s6 }
 0xa9b   : > { %v759_v15 = vrot.slane %v1803_v14, %v1603_v2  ;;  %v763_v16 = vrot.slane %v1803_v14, %v1605_v3  ;;  %v767_v17 = vrot.slane %v1803_v14, %v1607_v4  ;;  %v771_v19 = vrot.slane %v1803_v14, %v1609_v5 }
 0xa9c   : > { %vm863_vm8 = vcmp.eq.s32.totalorder %v862_v59, 1 }
 0xa9d   : > { %v776_v20 = vsel %vm201_vm0, %v759_v15, -inf  ;;  %v777_v21 = vsel %vm201_vm0, %v763_v16, -inf  ;;  %v778_v22 = vsel %vm201_vm0, %v767_v17, -inf  ;;  %v779_v23 = vsel %vm201_vm0, %v771_v19, -inf }
 0xa9e   : > { %v780_v24 = vmax.f32 %v776_v20, %v777_v21  ;;  %v781_v25 = vmax.f32 %v778_v22, %v779_v23 }
 0xaa0   : > { %v782_v26 = vmax.f32 %v780_v24, %v781_v25 }
 0xaa2   : > { %783 = vmax.xlane.f32.xlu1 %v782_v26 }
 0xb2f   : > { %v784_v27 = vpop.xlane.xlu1 %783 }
 0xb30   : > { %v789_v28 = vrot.slane %v784_v27, %v1603_v2 }
 0xb32   : > { %vm791_vm15 = vcmp.ge.f32.partialorder %v1803_v14, %v789_v28 }
 0xb33   : > { %v792_v29 = vsel %vm791_vm15, %v1631_v31, 512 }
 0xb34   : > { %v796_v30 = vrot.slane %v792_v29, %v1603_v2  ;;  %v800_v32 = vrot.slane %v792_v29, %v1605_v3  ;;  %v804_v33 = vrot.slane %v792_v29, %v1607_v4  ;;  %v808_v34 = vrot.slane %v792_v29, %v1609_v5 }
 0xb36   : > { %v809_v35 = vsel %vm201_vm0, %v796_v30, 2147483647  ;;  %v810_v36 = vsel %vm201_vm0, %v800_v32, 2147483647  ;;  %v811_v37 = vsel %vm201_vm0, %v804_v33, 2147483647 }
 0xb37   : > { %v812_v38 = vsel %vm201_vm0, %v808_v34, 2147483647  ;;  %vm813_vm1 = vcmp.lt.s32.totalorder %v809_v35, %v810_v36 }
 0xb38   : > { %v814_v39 = vsel %vm813_vm1, %v809_v35, %v810_v36  ;;  %vm815_vm2 = vcmp.lt.s32.totalorder %v811_v37, %v812_v38 }
 0xb39   : > { %v816_v40 = vsel %vm815_vm2, %v811_v37, %v812_v38 }
 0xb3a   : > { %vm817_vm3 = vcmp.lt.s32.totalorder %v814_v39, %v816_v40 }
 0xb3b   : > { %v818_v41 = vsel %vm817_vm3, %v814_v39, %v816_v40 }
 0xb3c   : > { %v820_v42 = vshra.s32 %v818_v41, 16  ;;  %v819_v44 = vand.u32 65535, %v818_v41 }
 0xb3e   : > { %v822_v43 = vcvt.s32.f32 %v820_v42  ;;  %v821_v46 = vcvt.s32.f32 %v819_v44 }
 0xb40   : > { %823 = vmin.xlane.f32.xlu0 %v822_v43 }
 0xbcd   : > { %v824_v45 = vpop.xlane.xlu0 %823 }
 0xbce   : > { %vm825_vm4 = vcmp.eq.f32.partialorder %v822_v43, %v824_v45  ;;  %v830_v48 = vcvt.f32.s32 %v824_v45 }
 0xbcf   : > { %v826_v47 = vsel %vm825_vm4, %v821_v46, inf }
 0xbd0   : > { %827 = vmin.xlane.f32.xlu1 %v826_v47  ;;  %v831_v50 = vshll.u32 %v830_v48, 16 }
 0xc5d   : > { %v828_v49 = vpop.xlane.xlu1 %827 }
 0xc5e   : > { %v829_v51 = vcvt.f32.s32 %v828_v49 }
 0xc60   : > { %v832_v52 = vadd.s32 %v831_v50, %v829_v51 }
 0xc62   : > { %v833_v53 = vrot.slane %v832_v52, 4 }
 0xc64   : > { %vm834_vm5 = vcmp.lt.s32.totalorder %v832_v52, %v833_v53 }
 0xc65   : > { %v835_v54 = vsel %vm834_vm5, %v832_v52, %v833_v53 }
 0xc66   : > { %v836_v55 = vrot.slane %v835_v54, 2 }
 0xc68   : > { %vm837_vm6 = vcmp.lt.s32.totalorder %v835_v54, %v836_v55 }
 0xc69   : > { %v838_v56 = vsel %vm837_vm6, %v835_v54, %v836_v55 }
 0xc6a   : > { %v839_v57 = vrot.slane %v838_v56, 1 }
 0xc6c   : > { %vm840_vm7 = vcmp.lt.s32.totalorder %v838_v56, %v839_v57 }
 0xc6d   : > { %v841_v58 = vsel %vm840_vm7, %v838_v56, %v839_v57 }
 0xc6e   : > { %1238 = vpush %v841_v58 }
 0xc9f   : > { %s1837_s7 = spop %1238 }
 0xca0   : > { %s851_s18 = sshra.s32 %s1837_s7, 3  ;;  %s854_s19 = sand.u32 7, %s1837_s7 }
 0xca1   : > { %s1226_s17 = sshll.u32 %s851_s18, 5  ;;  %p865_p5 = scmp.eq.s32.totalorder %s1837_s7, 198 }
 0xca2   : > { %s857_s27 = sadd.s32 %s1226_s17, %s854_s19 }
 0xca3   : > { %s858_s22 = scalar_lea.vmem [#allocation5], %s857_s27  ;;  %p1871_p0 = por %p865_p5, %p1831_p2 }
 0xca4   : > { %v859_v60 = vld [vmem:[%s858_s22] ss:$8 sm:$0xf] }
 0xca5   : > { %v860_v61 = vadd.f32 %v859_v60, %v1803_v14  ;;  %s973_s4 = scalar_select %p1871_p0, 1, 0 }
 0xca6   : > { %s1213_s24 = scalar_select %p1871_p0, 0, 1 }
 0xca7   : > { %v1843_v62 = vsel %vm863_vm8, %v1803_v14, %v860_v61  ;;  %v974_v47 = vstv %s973_s4  ;;  %s397_s4 = scalar_select %p395_p1, 1, 0 }
 0xca8   : > { %v871_v63 = vrot.slane %v1843_v62, %v1603_v2  ;;  %v875_v0 = vrot.slane %v1843_v62, %v1605_v3  ;;  %v879_v1 = vrot.slane %v1843_v62, %v1607_v4  ;;  %v883_v7 = vrot.slane %v1843_v62, %v1609_v5 }
 0xca9   : > { %vm975_vm2 = vcmp.eq.s32.totalorder %v974_v47, 1 }
 0xcaa   : > { %v888_v8 = vsel %vm201_vm0, %v871_v63, -inf  ;;  %v889_v9 = vsel %vm201_vm0, %v875_v0, -inf  ;;  %v890_v10 = vsel %vm201_vm0, %v879_v1, -inf  ;;  %v891_v11 = vsel %vm201_vm0, %v883_v7, -inf }
 0xcab   : > { %v892_v12 = vmax.f32 %v888_v8, %v889_v9  ;;  %v893_v6 = vmax.f32 %v890_v10, %v891_v11 }
 0xcad   : > { %v894_v13 = vmax.f32 %v892_v12, %v893_v6 }
 0xcaf   : > { %895 = vmax.xlane.f32.xlu0 %v894_v13 }
 0xd3c   : > { %v896_v14 = vpop.xlane.xlu0 %895 }
 0xd3d   : > { %v901_v15 = vrot.slane %v896_v14, %v1603_v2 }
 0xd3f   : > { %vm903_vm9 = vcmp.ge.f32.partialorder %v1843_v62, %v901_v15 }
 0xd40   : > { %v904_v16 = vsel %vm903_vm9, %v1631_v31, 512 }
 0xd41   : > { %v908_v17 = vrot.slane %v904_v16, %v1603_v2  ;;  %v912_v19 = vrot.slane %v904_v16, %v1605_v3  ;;  %v916_v20 = vrot.slane %v904_v16, %v1607_v4  ;;  %v920_v21 = vrot.slane %v904_v16, %v1609_v5 }
 0xd43   : > { %v921_v22 = vsel %vm201_vm0, %v908_v17, 2147483647  ;;  %v922_v23 = vsel %vm201_vm0, %v912_v19, 2147483647  ;;  %v923_v24 = vsel %vm201_vm0, %v916_v20, 2147483647 }
 0xd44   : > { %v924_v25 = vsel %vm201_vm0, %v920_v21, 2147483647  ;;  %vm925_vm10 = vcmp.lt.s32.totalorder %v921_v22, %v922_v23 }
 0xd45   : > { %v926_v26 = vsel %vm925_vm10, %v921_v22, %v922_v23  ;;  %vm927_vm11 = vcmp.lt.s32.totalorder %v923_v24, %v924_v25  ;;  %vm293_vm10 = vcmp.eq.s32.totalorder %v1625_v18, 0 }
 0xd46   : > { %v928_v27 = vsel %vm927_vm11, %v923_v24, %v924_v25 }
 0xd47   : > { %vm929_vm12 = vcmp.lt.s32.totalorder %v926_v26, %v928_v27 }
 0xd48   : > { %v930_v28 = vsel %vm929_vm12, %v926_v26, %v928_v27  ;;  %vm396_vm12 = vcmp.eq.s32.totalorder %v1625_v18, 1 }
 0xd49   : > { %v932_v29 = vshra.s32 %v930_v28, 16  ;;  %v931_v32 = vand.u32 65535, %v930_v28 }
 0xd4b   : > { %v934_v30 = vcvt.s32.f32 %v932_v29  ;;  %v933_v34 = vcvt.s32.f32 %v931_v32  ;;  %v294_v29 = vstv %s1644_s15  ;;  %s1217_s15 = sshll.u32 %s1476_s13, 4 }
 0xd4c   : > { %s1944_s13 = scalar_lea.hbm %s1990_s2, %s1217_s15 }
 0xd4d   : > { %935 = vmin.xlane.f32.xlu1 %v934_v30 }
 0xdda   : > { %v936_v33 = vpop.xlane.xlu1 %935 }
 0xddb   : > { %vm937_vm13 = vcmp.eq.f32.partialorder %v934_v30, %v936_v33  ;;  %v942_v36 = vcvt.f32.s32 %v936_v33  ;;  %v398_v30 = vstv %s397_s4 }
 0xddc   : > { %v938_v35 = vsel %vm937_vm13, %v933_v34, inf  ;;  %v295_v34 = vsel %vm293_vm10, %v294_v29, 4294967295  ;;  %vm399_vm11 = vcmp.eq.s32.totalorder %v398_v30, 1  ;;  %vm508_vm13 = vcmp.eq.s32.totalorder %v1625_v18, 2 }
 0xddd   : > { %939 = vmin.xlane.f32.xlu0 %v938_v35  ;;  %v943_v38 = vshll.u32 %v942_v36, 16  ;;  %v401_v36 = vstv %s1677_s3  ;;  %s173_s3 = scalar_lea.vmem [#allocation7], %s1591_s20 }
 0xe6a   : > { %v940_v37 = vpop.xlane.xlu0 %939 }
 0xe6b   : > { %v941_v39 = vcvt.f32.s32 %v940_v37 }
 0xe6d   : > { %v944_v40 = vadd.s32 %v943_v38, %v941_v39  ;;  %v513_v38 = vstv %s1717_s26  ;;  %v958_v39 = vstv %s1213_s24  ;;  %s1090_s26 = sshll.u32 %s173_s3, 4  ;;  %s1946_s26 = int_to_ptr.vmem [resolvable:$true] %s1090_s26 }
 0xe6f   : > { %v945_v41 = vrot.slane %v944_v40, 4 }
 0xe71   : > { %vm946_vm14 = vcmp.lt.s32.totalorder %v944_v40, %v945_v41 }
 0xe72   : > { %v947_v42 = vsel %vm946_vm14, %v944_v40, %v945_v41  ;;  %v625_v40 = vstv %s1757_s30 }
 0xe73   : > { %v948_v43 = vrot.slane %v947_v42, 2 }
 0xe75   : > { %vm949_vm15 = vcmp.lt.s32.totalorder %v947_v42, %v948_v43 }
 0xe76   : > { %v950_v44 = vsel %vm949_vm15, %v947_v42, %v948_v43  ;;  %vm620_vm15 = vcmp.eq.s32.totalorder %v1625_v18, 3  ;;  %v737_v43 = vstv %s1797_s29 }
 0xe77   : > { %v951_v45 = vrot.slane %v950_v44, 1 }
 0xe79   : > { %vm952_vm1 = vcmp.lt.s32.totalorder %v950_v44, %v951_v45 }
 0xe7a   : > { %v953_v46 = vsel %vm952_vm1, %v950_v44, %v951_v45  ;;  %v849_v45 = vstv %s1837_s7  ;;  %s1362_s7 = scalar_lea.vmem %s1946_s26, 16 }
 0xe7b   : > { %1240 = vpush %v953_v46  ;;  %p1363_p6 = scmp.ne.s32.totalorder %s1946_s26, %s1362_s7 }
 0xeac   : > { %s1877_s6 = spop %1240 }
 0xead   : > { %s963_s18 = sshra.s32 %s1877_s6, 3  ;;  %s966_s19 = sand.u32 7, %s1877_s6  ;;  %v961_v47 = vstv %s1877_s6 }
 0xeae   : > { %s1227_s17 = sshll.u32 %s963_s18, 5  ;;  %p977_p11 = scmp.eq.s32.totalorder %s1877_s6, 198 }
 0xeaf   : > { %s969_s27 = sadd.s32 %s1227_s17, %s966_s19  ;;  %s1366_s6 = sshll.u32 %s1439_s28, 4  ;;  %s1367_s6 = int_to_ptr.vmem [resolvable:$false] %s1366_s6 }
 0xeb0   : > { %s970_s22 = scalar_lea.vmem [#allocation5], %s969_s27  ;;  %p1909_p4 = por %p977_p11, %p1871_p0 }
 0xeb1   : > { %v971_v48 = vld [vmem:[%s970_s22] ss:$8 sm:$0xf]  ;;  %s1201_s18 = scalar_select %p1711_p8, 0, 1 }
 0xeb2   : > { %v972_v49 = vadd.f32 %v971_v48, %v1843_v62  ;;  %s1204_s19 = scalar_select %p1751_p13, 0, 1 }
 0xeb3   : > { %s1207_s27 = scalar_select %p1791_p7, 0, 1  ;;  %v510_v32 = vstv %s1201_s18 }
 0xeb4   : > { %v976_v50 = vsel %vm975_vm2, %v1843_v62, %v972_v49  ;;  %s1210_s22 = scalar_select %p1831_p2, 0, 1  ;;  %v622_v33 = vstv %s1204_s19  ;;  %vm511_vm14 = vcmp.eq.s32.totalorder %v510_v32, 1  ;;  %vm400_vm2 = vmand %vm396_vm12, %vm399_vm11  ;;  %vm1068_vm11 = vcmp.eq.s32.totalorder %v1625_v18, 7 }
 0xeb5   : > { %v983_v51 = vrot.slane %v976_v50, %v1603_v2  ;;  %v987_v52 = vrot.slane %v976_v50, %v1605_v3  ;;  %v991_v53 = vrot.slane %v976_v50, %v1607_v4  ;;  %v995_v54 = vrot.slane %v976_v50, %v1609_v5  ;;  %s1216_s23 = scalar_select %p1909_p4, 0, 1 }
 0xeb6   : > { %v734_v35 = vstv %s1207_s27  ;;  %v846_v37 = vstv %s1210_s22  ;;  %vm623_vm1 = vcmp.eq.s32.totalorder %v622_v33, 1  ;;  %v402_v42 = vsel %vm400_vm2, %v401_v36, %v295_v34  ;;  %p1364_p8 = pnand %p1363_p6, %p1546_p12  ;;  %s1368_s4 = scalar_lea.vmem %s1367_s6, 32 }
 0xeb7   : > { %v1000_v55 = vsel %vm201_vm0, %v983_v51, -inf  ;;  %v1001_v56 = vsel %vm201_vm0, %v987_v52, -inf  ;;  %v1002_v57 = vsel %vm201_vm0, %v991_v53, -inf  ;;  %v1003_v58 = vsel %vm201_vm0, %v995_v54, -inf  ;;  %p1369_p13 = scmp.lt.s32.totalorder %s1946_s26, %s1367_s6  ;;  %p1370_p3 = scmp.lt.s32.totalorder %s1368_s4, %s1362_s7 }
 0xeb8   : > { %v1004_v59 = vmax.f32 %v1000_v55, %v1001_v56  ;;  %v1005_v60 = vmax.f32 %v1002_v57, %v1003_v58  ;;  %v1070_v41 = vstv %s1216_s23  ;;  %p1365_p10 = pneg %p1364_p8 }
 0xeb9   : > { %vm1071_vm12 = vcmp.eq.s32.totalorder %v1070_v41, 1  ;;  %p1371_p7 = por %p1370_p3, %p1369_p13 }
 0xeba   : > { %v1006_v61 = vmax.f32 %v1004_v59, %v1005_v60 }
 0xebb   : > { %p1372_p9 = pnand %p1371_p7, %p1365_p10 }
 0xebc   : > { %1007 = vmax.xlane.f32.xlu1 %v1006_v61 }
 0xf49   : > { %v1008_v62 = vpop.xlane.xlu1 %1007 }
 0xf4a   : > { %v1013_v63 = vrot.slane %v1008_v62, %v1603_v2 }
 0xf4c   : > { %vm1015_vm3 = vcmp.ge.f32.partialorder %v976_v50, %v1013_v63 }
 0xf4d   : > { %v1016_v0 = vsel %vm1015_vm3, %v1631_v31, 512  ;;  %vm732_vm3 = vcmp.eq.s32.totalorder %v1625_v18, 4 }
 0xf4e   : > { %v1020_v1 = vrot.slane %v1016_v0, %v1603_v2  ;;  %v1024_v7 = vrot.slane %v1016_v0, %v1605_v3  ;;  %v1028_v8 = vrot.slane %v1016_v0, %v1607_v4  ;;  %v1032_v9 = vrot.slane %v1016_v0, %v1609_v5 }
 0xf50   : > { %v1033_v10 = vsel %vm201_vm0, %v1020_v1, 2147483647  ;;  %v1034_v11 = vsel %vm201_vm0, %v1024_v7, 2147483647  ;;  %v1035_v12 = vsel %vm201_vm0, %v1028_v8, 2147483647 }
 0xf51   : > { %v1036_v6 = vsel %vm201_vm0, %v1032_v9, 2147483647  ;;  %vm1037_vm4 = vcmp.lt.s32.totalorder %v1033_v10, %v1034_v11 }
 0xf52   : > { %v1038_v13 = vsel %vm1037_vm4, %v1033_v10, %v1034_v11  ;;  %vm1039_vm5 = vcmp.lt.s32.totalorder %v1035_v12, %v1036_v6  ;;  %vm735_vm4 = vcmp.eq.s32.totalorder %v734_v35, 1 }
 0xf53   : > { %v1040_v31 = vsel %vm1039_vm5, %v1035_v12, %v1036_v6  ;;  %vm512_vm5 = vmand %vm508_vm13, %vm511_vm14 }
 0xf54   : > { %vm1041_vm6 = vcmp.lt.s32.totalorder %v1038_v13, %v1040_v31  ;;  %v514_v44 = vsel %vm512_vm5, %v513_v38, %v402_v42  ;;  %vm736_vm10 = vmand %vm732_vm3, %vm735_vm4 }
 0xf55   : > { %v1042_v2 = vsel %vm1041_vm6, %v1038_v13, %v1040_v31  ;;  %vm844_vm6 = vcmp.eq.s32.totalorder %v1625_v18, 5 }
 0xf56   : > { %v1044_v14 = vshra.s32 %v1042_v2, 16  ;;  %v1043_v4 = vand.u32 65535, %v1042_v2 }
 0xf58   : > { %v1046_v3 = vcvt.s32.f32 %v1044_v14  ;;  %v1045_v5 = vcvt.s32.f32 %v1043_v4 }
 0xf5a   : > { %1047 = vmin.xlane.f32.xlu0 %v1046_v3 }
 0xfe7   : > { %v1048_v15 = vpop.xlane.xlu0 %1047 }
 0xfe8   : > { %vm1049_vm7 = vcmp.eq.f32.partialorder %v1046_v3, %v1048_v15  ;;  %v1054_v17 = vcvt.f32.s32 %v1048_v15 }
 0xfe9   : > { %v1050_v16 = vsel %vm1049_vm7, %v1045_v5, inf  ;;  %vm847_vm7 = vcmp.eq.s32.totalorder %v846_v37, 1 }
 0xfea   : > { %1051 = vmin.xlane.f32.xlu1 %v1050_v16  ;;  %v1055_v20 = vshll.u32 %v1054_v17, 16  ;;  %vm848_vm13 = vmand %vm844_vm6, %vm847_vm7 }
0x1077   : > { %v1052_v19 = vpop.xlane.xlu1 %1051 }
0x1078   : > { %v1053_v21 = vcvt.f32.s32 %v1052_v19 }
0x107a   : > { %v1056_v22 = vadd.s32 %v1055_v20, %v1053_v21 }
0x107c   : > { %v1057_v23 = vrot.slane %v1056_v22, 4 }
0x107e   : > { %vm1058_vm0 = vcmp.lt.s32.totalorder %v1056_v22, %v1057_v23 }
0x107f   : > { %v1059_v24 = vsel %vm1058_vm0, %v1056_v22, %v1057_v23  ;;  %vm624_vm0 = vmand %vm620_vm15, %vm623_vm1  ;;  %vm1075_vm15 = vcmask 57344  }
0x1080   : > { %v1060_v25 = vrot.slane %v1059_v24, 2  ;;  %v626_v46 = vsel %vm624_vm0, %v625_v40, %v514_v44  ;;  %vm1072_vm1 = vmand %vm1068_vm11, %vm1071_vm12 }
0x1081   : > { %v738_v48 = vsel %vm736_vm10, %v737_v43, %v626_v46 }
0x1082   : > { %vm1061_vm8 = vcmp.lt.s32.totalorder %v1059_v24, %v1060_v25  ;;  %v850_v49 = vsel %vm848_vm13, %v849_v45, %v738_v48 }
0x1083   : > { %v1062_v26 = vsel %vm1061_vm8, %v1059_v24, %v1060_v25  ;;  %vm956_vm8 = vcmp.eq.s32.totalorder %v1625_v18, 6 }
0x1084   : > { %v1063_v27 = vrot.slane %v1062_v26, 1 }
0x1086   : > { %vm1064_vm9 = vcmp.lt.s32.totalorder %v1062_v26, %v1063_v27 }
0x1087   : > { %v1065_v28 = vsel %vm1064_vm9, %v1062_v26, %v1063_v27  ;;  %vm959_vm9 = vcmp.eq.s32.totalorder %v958_v39, 1 }
0x1088   : > { %1242 = vpush %v1065_v28  ;;  %vm960_vm14 = vmand %vm956_vm8, %vm959_vm9 }
0x1089   : > { %v962_v50 = vsel %vm960_vm14, %v961_v47, %v850_v49 }
0x10b9   : > { %s1243_s30 = spop %1242 }
0x10ba   : > { %v1073_v51 = vstv %s1243_s30 }
0x10bb   : > { %v1074_v18 = vsel %vm1072_vm1, %v1073_v51, %v962_v50 }
0x10bc   : > { %1076 = vst.msk [vmem:[%s173_s3] sm:$0x1] %vm1075_vm15, %v1074_v18 }
0x10bd   : > { %1375 = shalt.err (!%p1372_p9)
}
0x10be   : > { %s1376_s20 = scalar_lea.hbm %s1944_s13, 16  ;;  %s1380_s17 = scalar_lea.hbm %s1990_s2, 32 }
0x10bf   : > { %p1377_p2 = scmp.ne.s32.totalorder %s1944_s13, %s1376_s20  ;;  %p1381_p1 = scmp.lt.u32.totalorder %s1944_s13, %s1990_s2 }
0x10c0   : > { %p1382_p11 = scmp.lt.u32.totalorder %s1380_s17, %s1376_s20  ;;  %p1384_p6 = scmp.lt.u32.totalorder %s1376_s20, %s1944_s13 }
0x10c1   : > { %p1378_p5 = pnand %p1377_p2, %p1546_p12 }
0x10c2   : > { %p1383_p4 = por %p1382_p11, %p1381_p1 }
0x10c3   : > { %p1379_p0 = pneg %p1378_p5 }
0x10c4   : > { %p1385_p8 = por %p1384_p6, %p1383_p4 }
0x10c6   : > { %p1386_p10 = pnand %p1385_p8, %p1379_p0 }
0x10c8   : > { %1389 = shalt.err (!%p1386_p10)
}
0x10c9   : > { %1250 = dma.vmem_to_hbm [thread:$0]  (%p1546_p12), %s1946_s26, 16, %s1944_s13, %s1078_s5  }
0x10ca PF: > { %s1102_s24 = sand.u32 1, %s1420_s9   ;;  %p2011_p13 = scmp.ne.s32.totalorder %s1995_s16, 0 }
0x10cb   : > { %p2012_p3 = scmp.ge.s32.totalorder %s1432_s12, 2  ;;  %s1103_s23 = scalar_lea.sflag [#allocation4], %s1102_s24 }
0x10cd   : > { %p1261_p7 = pnand %p2012_p3, %p2011_p13 }
0x10cf   : > { %1415 = dma.done.wait (!%p1261_p7), %s1103_s23, 16  }
0x10d0   : > { %1417 = vsyncadd (!%p1261_p7), %s1103_s23, 4294967280  ;;  %p16_p9 = scmp.ge.s32.totalorder %s1511_s21, 4   ;;  %s2013_s9 = smov %s1424_s10 }
0x10d1   : > { %s2014_s10 = smov %s1428_s11  ;;  %s2015_s11 = smov %s1542_s8 }
0x10d2   : > { %s2016_s12 = smov %s1511_s21  ;;  %18 = sbr.rel (!%p16_p9) target bundleno = 6 (0x6), region = 84 }
0x10d9   :  { %1107 = vsyncpa [#allocation3], 1 }
0x10da   :  { %1109 = vsyncpa [#allocation3 + $0x1], 1 }
0x10db   :  { %1110 = vsyncpa [#allocation6], 1 }
0x10dc   :  { %1111 = vsyncpa [#allocation4], 1 }
0x10dd   :  { %1113 = vsyncpa [#allocation4 + $0x1], 1 }

</bundles_post_ra>
